<compile_context>
chip_gen: v6e
topology: v6e:2x2x1
jax: 0.10.0
libtpu: 0.0.40
codegen_flags: <defaults>
</compile_context>

<pallas_src>
import functools

import jax
import jax.numpy as jnp
import numpy as np
from jax.experimental import pallas as pl
from jax.experimental.pallas import tpu as pltpu


def _round_up(x, m):
    return ((x + m - 1) // m) * m


# ---------------------------------------------------------------------------
# Kernel 1: attention3d forward fused with per-example expert aggregation
# ---------------------------------------------------------------------------
def attention_agg_kernel(x_ref, w1_ref, w2_ref, wflat_ref, bias_ref,
                         att_ref, aggw_ref, aggb_ref, *, temperature):
    # x_ref:     (B, C, S_in)      VMEM
    # w1_ref:    (C, hidden)       VMEM  (fc1 weight, transposed)
    # w2_ref:    (hidden, K)       VMEM  (fc2 weight, transposed)
    # wflat_ref: (K, OC*CKp)       VMEM  (expert weights, flattened, CK zero-padded)
    # bias_ref:  (K, OC)           VMEM
    # att_ref:   (B, K)            VMEM out
    # aggw_ref:  (B, OC*CKp)       VMEM out (bf16)
    # aggb_ref:  (B, OC)           VMEM out (f32)
    # TODO(synk): for very large D*H*W, tile the mean over the spatial axis with a
    # partial-sum accumulator instead of one (B, C, S_in) block.
    pooled = jnp.mean(x_ref[...], axis=2)                                        # (B, C)
    h = jnp.maximum(
        jnp.dot(pooled, w1_ref[...], preferred_element_type=jnp.float32), 0.0)   # (B, hidden)
    logits = jnp.dot(h, w2_ref[...], preferred_element_type=jnp.float32)         # (B, K)
    z = logits * (1.0 / temperature)
    z = z - jnp.max(z, axis=1, keepdims=True)
    e = jnp.exp(z)
    att = e / jnp.sum(e, axis=1, keepdims=True)                                   # (B, K) f32
    att_ref[...] = att.astype(att_ref.dtype)
    # Expert mixing on the MXU (one small matmul, done once per example).
    aggw_ref[...] = jnp.dot(att, wflat_ref[...],
                            preferred_element_type=jnp.float32).astype(aggw_ref.dtype)
    aggb_ref[...] = jnp.dot(att, bias_ref[...],
                            preferred_element_type=jnp.float32).astype(aggb_ref.dtype)


def attention_and_aggregate(x_flat, w1_t, w2_t, w_flat, bias, temperature, agg_dtype):
    B, C, S_in = x_flat.shape
    Hh = w1_t.shape[1]
    K = w2_t.shape[1]
    OCK = w_flat.shape[1]
    OC = bias.shape[1]
    return pl.pallas_call(
        functools.partial(attention_agg_kernel, temperature=temperature),
        out_shape=(
            jax.ShapeDtypeStruct((B, K), jnp.float32),
            jax.ShapeDtypeStruct((B, OCK), agg_dtype),
            jax.ShapeDtypeStruct((B, OC), jnp.float32),
        ),
        grid=(1,),
        in_specs=[
            pl.BlockSpec((B, C, S_in), lambda i: (0, 0, 0)),
            pl.BlockSpec((C, Hh), lambda i: (0, 0)),
            pl.BlockSpec((Hh, K), lambda i: (0, 0)),
            pl.BlockSpec((K, OCK), lambda i: (0, 0)),
            pl.BlockSpec((K, OC), lambda i: (0, 0)),
        ],
        out_specs=(
            pl.BlockSpec((B, K), lambda i: (0, 0)),
            pl.BlockSpec((B, OCK), lambda i: (0, 0)),
            pl.BlockSpec((B, OC), lambda i: (0, 0)),
        ),
    )(x_flat, w1_t, w2_t, w_flat, bias)


# ---------------------------------------------------------------------------
# Kernel 2: conv-as-matmul with lane-dense (OC, S_tile) output
# ---------------------------------------------------------------------------
def dyn_conv_kernel(aggw_ref, aggb_ref, patches_ref, out_ref):
    # aggw_ref:    (1, OC, CKp)     VMEM (bf16)  aggregated weight for this example
    # aggb_ref:    (1, OC, 1)       VMEM (f32)   aggregated bias
    # patches_ref: (1, CKp, Ts)     VMEM (bf16)  im2col patches, S on lanes
    # out_ref:     (1, OC, Ts)      VMEM (f32)   lane-dense output (Ts multiple of 128)
    out = jnp.dot(aggw_ref[0], patches_ref[0], preferred_element_type=jnp.float32)  # (OC, Ts)
    out_ref[0] = (out + aggb_ref[0]).astype(out_ref.dtype)


def dyn_conv_matmul(aggw, aggb, patches, s_tile):
    B, OC, CKp = aggw.shape
    _, _, S_pad = patches.shape
    n_s = S_pad // s_tile
    return pl.pallas_call(
        dyn_conv_kernel,
        out_shape=jax.ShapeDtypeStruct((B, OC, S_pad), jnp.float32),
        grid=(B, n_s),
        in_specs=[
            pl.BlockSpec((1, OC, CKp), lambda b, s: (b, 0, 0)),     # aggregated weight
            pl.BlockSpec((1, OC, 1), lambda b, s: (b, 0, 0)),       # aggregated bias
            pl.BlockSpec((1, CKp, s_tile), lambda b, s: (b, 0, s)),  # patches tile
        ],
        out_specs=pl.BlockSpec((1, OC, s_tile), lambda b, s: (b, 0, s)),
        compiler_params=pltpu.CompilerParams(
            dimension_semantics=("parallel", "parallel")),
    )(aggw, aggb, patches)


# ---------------------------------------------------------------------------
# Full forward (glue: reshapes / im2col, no transpose passes)
# ---------------------------------------------------------------------------
def dynamic_conv3d_forward(x, params, *, kernel_size, temperature,
                           matmul_dtype=jnp.bfloat16, s_tile=128):
    B, C, D, H, W = x.shape
    kk = kernel_size
    weight = params["weight"]   # (K, OC, C, kk, kk, kk)
    bias = params["bias"]       # (K, OC)
    fc1_w = params["fc1_w"]     # (hidden, C)
    fc2_w = params["fc2_w"]     # (K, hidden)
    K, OC = weight.shape[0], weight.shape[1]

    CK = C * kk ** 3
    CKp = _round_up(CK, 128)    # tile-aligned contraction depth
    Do, Ho, Wo = D - kk + 1, H - kk + 1, W - kk + 1
    S = Do * Ho * Wo
    S_pad = _round_up(S, s_tile)

    # Expert weights flattened to (K, OC*CKp); CK ordered (ic, kd, kh, kw), zero-padded.
    w_ock = weight.reshape(K, OC, CK)
    w_ock = jnp.pad(w_ock, ((0, 0), (0, 0), (0, CKp - CK)))
    w_flat = w_ock.reshape(K, OC * CKp)

    # Kernel 1: attention + expert mixing.
    x_flat = x.reshape(B, C, D * H * W)
    att, aggw_flat, aggb = attention_and_aggregate(
        x_flat, fc1_w.T, fc2_w.T, w_flat, bias, float(temperature), matmul_dtype)
    aggw = aggw_flat.reshape(B, OC, CKp)        # (B, OC, CKp), bf16
    aggb = aggb.reshape(B, OC, 1)               # (B, OC, 1),   f32

    # im2col directly in (B, CK, S) order: CK on sublanes, S on lanes -> no transpose.
    # TODO(synk): for large inputs (v5e mem-bound), replace the k^3 im2col materialization
    # with k^3 shifted-window matmuls accumulated inside the kernel.
    patch_list = []
    for kd in range(kk):
        for kh in range(kk):
            for kw in range(kk):
                patch_list.append(x[:, :, kd:kd + Do, kh:kh + Ho, kw:kw + Wo])
    stacked = jnp.stack(patch_list, axis=2)                         # (B, C, kk^3, Do, Ho, Wo)
    patches = stacked.reshape(B, CK, S)                             # (B, CK, S)
    patches = jnp.pad(patches, ((0, 0), (0, CKp - CK), (0, S_pad - S)))
    patches = patches.astype(matmul_dtype)

    out_p = dyn_conv_matmul(aggw, aggb, patches, s_tile)            # (B, OC, S_pad) f32
    out = out_p[:, :, :S].reshape(B, OC, Do, Ho, Wo)                # NCDHW, no transpose
    return out, att


# ---------------------------------------------------------------------------
# Main
# ---------------------------------------------------------------------------
if __name__ == "__main__":
    # module config
    B, C, D, H, W = 2, 4, 8, 8, 8
    OC, kk, K, ratio, temperature = 8, 3, 4, 0.25, 34
    hidden = int(C * ratio) + 1          # in_channels != 3 branch

    key = jax.random.PRNGKey(0)
    k1, k2, k3, k4, k5 = jax.random.split(key, 5)
    x = jax.random.normal(k1, (B, C, D, H, W), dtype=jnp.float32)
    params = {
        "weight": jax.random.normal(k2, (K, OC, C, kk, kk, kk), dtype=jnp.float32),
        "bias": 0.1 * jax.random.normal(k3, (K, OC), dtype=jnp.float32),       # torch.Tensor is uninit; deterministic init here
        "fc1_w": jax.random.normal(k4, (hidden, C), dtype=jnp.float32) * 0.5,  # Conv3d 1x1x1 == dense
        "fc2_w": jax.random.normal(k5, (K, hidden), dtype=jnp.float32) * 0.5,
    }

    out, att = dynamic_conv3d_forward(x, params, kernel_size=kk, temperature=temperature)
    out = jax.block_until_ready(out)
    att = jax.block_until_ready(att)

    # ---- numpy float64 reference (exact PyTorch semantics) ----
    xn = np.asarray(x, np.float64)
    wn = np.asarray(params["weight"], np.float64)
    bn = np.asarray(params["bias"], np.float64)
    f1 = np.asarray(params["fc1_w"], np.float64)
    f2 = np.asarray(params["fc2_w"], np.float64)

    pooled = xn.mean(axis=(2, 3, 4))                       # AdaptiveAvgPool3d(1)
    h = np.maximum(pooled @ f1.T, 0.0)
    logits = h @ f2.T
    z = logits / temperature
    e = np.exp(z - z.max(axis=1, keepdims=True))
    att_ref = e / e.sum(axis=1, keepdims=True)

    agg_w = (att_ref @ wn.reshape(K, -1)).reshape(B, OC, C, kk, kk, kk)
    agg_b = att_ref @ bn                                   # (B, OC)

    Do, Ho, Wo = D - kk + 1, H - kk + 1, W - kk + 1
    ref = np.zeros((B, OC, Do, Ho, Wo), np.float64)
    for kd in range(kk):
        for kh in range(kk):
            for kw in range(kk):
                xs = xn[:, :, kd:kd + Do, kh:kh + Ho, kw:kw + Wo]
                ref += np.einsum("boi,bidhw->bodhw", agg_w[:, :, :, kd, kh, kw], xs)
    ref += agg_b[:, :, None, None, None]

    # attention path is pure f32 -> tight tolerance
    np.testing.assert_allclose(np.asarray(att, np.float64), att_ref, rtol=1e-4, atol=1e-5)
    # conv matmul uses bf16 inputs with f32 accumulation -> wider absolute tolerance
    np.testing.assert_allclose(np.asarray(out, np.float64), ref, rtol=2e-2, atol=6e-2)
    assert out.shape == (B, OC, Do, Ho, Wo)

    print("KERNEL_OK")
</pallas_src>

<mosaic_0001>
module attributes {stable_mosaic.version = 11 : i64} {
  func.func @attention_agg_kernel(%arg0: i32, %arg1: memref<2x4x512xf32, #tpu.memory_space<vmem>>, %arg2: memref<4x2xf32, #tpu.memory_space<vmem>>, %arg3: memref<2x4xf32, #tpu.memory_space<vmem>>, %arg4: memref<4x1024xf32, #tpu.memory_space<vmem>>, %arg5: memref<4x8xf32, #tpu.memory_space<vmem>>, %arg6: memref<2x4xf32, #tpu.memory_space<vmem>>, %arg7: memref<2x1024xbf16, #tpu.memory_space<vmem>>, %arg8: memref<2x8xf32, #tpu.memory_space<vmem>>) attributes {dimension_semantics = [#tpu.dimension_semantics<arbitrary>], iteration_bounds = array<i64: 1>, scalar_prefetch = 0 : i64, scratch_operands = 0 : i64, tpu.core_type = #tpu.core_type<tc>, window_params = [{pipeline_mode = #tpu.pipeline_mode<synchronous>, transform_indices = @transform_0, window_bounds = array<i64: 2, 4, 512>}, {pipeline_mode = #tpu.pipeline_mode<synchronous>, transform_indices = @transform_1, window_bounds = array<i64: 4, 2>}, {pipeline_mode = #tpu.pipeline_mode<synchronous>, transform_indices = @transform_2, window_bounds = array<i64: 2, 4>}, {pipeline_mode = #tpu.pipeline_mode<synchronous>, transform_indices = @transform_3, window_bounds = array<i64: 4, 1024>}, {pipeline_mode = #tpu.pipeline_mode<synchronous>, transform_indices = @transform_4, window_bounds = array<i64: 4, 8>}, {pipeline_mode = #tpu.pipeline_mode<synchronous>, transform_indices = @transform_5, window_bounds = array<i64: 2, 4>}, {pipeline_mode = #tpu.pipeline_mode<synchronous>, transform_indices = @transform_6, window_bounds = array<i64: 2, 1024>}, {pipeline_mode = #tpu.pipeline_mode<synchronous>, transform_indices = @transform_7, window_bounds = array<i64: 2, 8>}]} {
    %c0 = arith.constant 0 : index
    %c0_0 = arith.constant 0 : index
    %c0_1 = arith.constant 0 : index
    %0 = vector.load %arg1[%c0, %c0_0, %c0_1] : memref<2x4x512xf32, #tpu.memory_space<vmem>>, vector<2x4x512xf32>
    %cst = arith.constant dense<0.000000e+00> : vector<2x4xf32>
    %1 = vector.multi_reduction <add>, %0, %cst [2] : vector<2x4x512xf32> to vector<2x4xf32>
    %cst_2 = arith.constant 5.120000e+02 : f32
    %2 = vector.broadcast %cst_2 : f32 to vector<2x4xf32>
    %3 = arith.divf %1, %2 : vector<2x4xf32>
    %c0_3 = arith.constant 0 : index
    %c0_4 = arith.constant 0 : index
    %4 = vector.load %arg2[%c0_3, %c0_4] : memref<4x2xf32, #tpu.memory_space<vmem>>, vector<4x2xf32>
    %cst_5 = arith.constant dense<0.000000e+00> : vector<2x2xf32>
    %5 = tpu.matmul %3, %4, %cst_5 {dimension_numbers = #tpu.dot_dimension_numbers<[1], [0], [0], [1], [0, 0, 1, 1], [], []>} : vector<2x4xf32>, vector<4x2xf32>, vector<2x2xf32> -> vector<2x2xf32>
    %cst_6 = arith.constant 0.000000e+00 : f32
    %6 = vector.broadcast %cst_6 : f32 to vector<2x2xf32>
    %7 = arith.maximumf %5, %6 : vector<2x2xf32>
    %c0_7 = arith.constant 0 : index
    %c0_8 = arith.constant 0 : index
    %8 = vector.load %arg3[%c0_7, %c0_8] : memref<2x4xf32, #tpu.memory_space<vmem>>, vector<2x4xf32>
    %cst_9 = arith.constant dense<0.000000e+00> : vector<2x4xf32>
    %9 = tpu.matmul %7, %8, %cst_9 {dimension_numbers = #tpu.dot_dimension_numbers<[1], [0], [0], [1], [0, 0, 1, 1], [], []>} : vector<2x2xf32>, vector<2x4xf32>, vector<2x4xf32> -> vector<2x4xf32>
    %cst_10 = arith.constant 0.0294117648 : f32
    %10 = vector.broadcast %cst_10 : f32 to vector<2x4xf32>
    %11 = arith.mulf %9, %10 : vector<2x4xf32>
    %cst_11 = arith.constant dense<0xFF800000> : vector<2xf32>
    %12 = vector.multi_reduction <maximumf>, %11, %cst_11 [1] : vector<2x4xf32> to vector<2xf32>
    %13 = vector.shape_cast %12 : vector<2xf32> to vector<2x1xf32>
    %14 = vector.broadcast %13 : vector<2x1xf32> to vector<2x4xf32>
    %15 = arith.subf %11, %14 : vector<2x4xf32>
    %16 = math.exp %15 : vector<2x4xf32>
    %cst_12 = arith.constant dense<0.000000e+00> : vector<2xf32>
    %17 = vector.multi_reduction <add>, %16, %cst_12 [1] : vector<2x4xf32> to vector<2xf32>
    %18 = vector.shape_cast %17 : vector<2xf32> to vector<2x1xf32>
    %19 = vector.broadcast %18 : vector<2x1xf32> to vector<2x4xf32>
    %20 = arith.divf %16, %19 : vector<2x4xf32>
    %c0_13 = arith.constant 0 : index
    %c0_14 = arith.constant 0 : index
    %21 = vector.load %arg6[%c0_13, %c0_14] : memref<2x4xf32, #tpu.memory_space<vmem>>, vector<2x4xf32>
    tpu.vector_store %arg6[%c0_13, %c0_14], %20 {strides = array<i32>} : memref<2x4xf32, #tpu.memory_space<vmem>>, vector<2x4xf32>,
    %c0_15 = arith.constant 0 : index
    %c0_16 = arith.constant 0 : index
    %22 = vector.load %arg4[%c0_15, %c0_16] : memref<4x1024xf32, #tpu.memory_space<vmem>>, vector<4x1024xf32>
    %cst_17 = arith.constant dense<0.000000e+00> : vector<2x1024xf32>
    %23 = tpu.matmul %20, %22, %cst_17 {dimension_numbers = #tpu.dot_dimension_numbers<[1], [0], [0], [1], [0, 0, 1, 1], [], []>} : vector<2x4xf32>, vector<4x1024xf32>, vector<2x1024xf32> -> vector<2x1024xf32>
    %24 = arith.truncf %23 : vector<2x1024xf32> to vector<2x1024xbf16>
    %c0_18 = arith.constant 0 : index
    %c0_19 = arith.constant 0 : index
    %25 = vector.load %arg7[%c0_18, %c0_19] : memref<2x1024xbf16, #tpu.memory_space<vmem>>, vector<2x1024xbf16>
    tpu.vector_store %arg7[%c0_18, %c0_19], %24 {strides = array<i32>} : memref<2x1024xbf16, #tpu.memory_space<vmem>>, vector<2x1024xbf16>,
    %c0_20 = arith.constant 0 : index
    %c0_21 = arith.constant 0 : index
    %26 = vector.load %arg5[%c0_20, %c0_21] : memref<4x8xf32, #tpu.memory_space<vmem>>, vector<4x8xf32>
    %cst_22 = arith.constant dense<0.000000e+00> : vector<2x8xf32>
    %27 = tpu.matmul %20, %26, %cst_22 {dimension_numbers = #tpu.dot_dimension_numbers<[1], [0], [0], [1], [0, 0, 1, 1], [], []>} : vector<2x4xf32>, vector<4x8xf32>, vector<2x8xf32> -> vector<2x8xf32>
    %c0_23 = arith.constant 0 : index
    %c0_24 = arith.constant 0 : index
    %28 = vector.load %arg8[%c0_23, %c0_24] : memref<2x8xf32, #tpu.memory_space<vmem>>, vector<2x8xf32>
    tpu.vector_store %arg8[%c0_23, %c0_24], %27 {strides = array<i32>} : memref<2x8xf32, #tpu.memory_space<vmem>>, vector<2x8xf32>,
    return
  }
  func.func @transform_0(%arg0: i32) -> (i32, i32, i32) {
    %c0_i32 = arith.constant 0 : i32
    %c0_i32_0 = arith.constant 0 : i32
    %c0_i32_1 = arith.constant 0 : i32
    %c0_i32_2 = arith.constant 0 : i32
    return %c0_i32, %c0_i32_0, %c0_i32_1 : i32, i32, i32
  }
  func.func @transform_1(%arg0: i32) -> (i32, i32) {
    %c0_i32 = arith.constant 0 : i32
    %c0_i32_0 = arith.constant 0 : i32
    %c0_i32_1 = arith.constant 0 : i32
    return %c0_i32, %c0_i32_0 : i32, i32
  }
  func.func @transform_2(%arg0: i32) -> (i32, i32) {
    %c0_i32 = arith.constant 0 : i32
    %c0_i32_0 = arith.constant 0 : i32
    %c0_i32_1 = arith.constant 0 : i32
    return %c0_i32, %c0_i32_0 : i32, i32
  }
  func.func @transform_3(%arg0: i32) -> (i32, i32) {
    %c0_i32 = arith.constant 0 : i32
    %c0_i32_0 = arith.constant 0 : i32
    %c0_i32_1 = arith.constant 0 : i32
    return %c0_i32, %c0_i32_0 : i32, i32
  }
  func.func @transform_4(%arg0: i32) -> (i32, i32) {
    %c0_i32 = arith.constant 0 : i32
    %c0_i32_0 = arith.constant 0 : i32
    %c0_i32_1 = arith.constant 0 : i32
    return %c0_i32, %c0_i32_0 : i32, i32
  }
  func.func @transform_5(%arg0: i32) -> (i32, i32) {
    %c0_i32 = arith.constant 0 : i32
    %c0_i32_0 = arith.constant 0 : i32
    %c0_i32_1 = arith.constant 0 : i32
    return %c0_i32, %c0_i32_0 : i32, i32
  }
  func.func @transform_6(%arg0: i32) -> (i32, i32) {
    %c0_i32 = arith.constant 0 : i32
    %c0_i32_0 = arith.constant 0 : i32
    %c0_i32_1 = arith.constant 0 : i32
    return %c0_i32, %c0_i32_0 : i32, i32
  }
  func.func @transform_7(%arg0: i32) -> (i32, i32) {
    %c0_i32 = arith.constant 0 : i32
    %c0_i32_0 = arith.constant 0 : i32
    %c0_i32_1 = arith.constant 0 : i32
    return %c0_i32, %c0_i32_0 : i32, i32
  }
}

</mosaic_0001>

<bundles_post_ra>
// kernel: tpu_custom_call.1
= control target key start
LH: loop header
LB: loop body
LE: loop exit
PB: predicated region body
PF: predicated region fallthrough
CT: control target
= control target key end

     0   :  { %13 = vsyncpa [#allocation3], 0  ;;  %s1066_s0 = inlined_call_operand.hbm [shape: f32[2,4,512], index: 0, kind: input, shape index: {}]   ;;  %s1067_s1 = inlined_call_operand.vmem [shape: f32[4,2], index: 1, kind: input, shape index: {}]   ;;  %s1068_s2 = inlined_call_operand.vmem [shape: f32[2,4], index: 2, kind: input, shape index: {}]   ;;  %s1069_s3 = inlined_call_operand.hbm [shape: f32[4,1024], index: 3, kind: input, shape index: {}]   ;;  %s1070_s4 = inlined_call_operand.vmem [shape: f32[4,8], index: 4, kind: input, shape index: {}]   ;;  %s1071_s5 = inlined_call_operand.hbm [shape: f32[2,4], index: 5, kind: output, shape index: {0}]   ;;  %s1072_s6 = inlined_call_operand.hbm [shape: bf16[2,1024], index: 6, kind: output, shape index: {1}]   ;;  %s1073_s7 = inlined_call_operand.hbm [shape: f32[2,8], index: 7, kind: output, shape index: {2}]  }
   0x1   :  { %14 = vsyncpa [#allocation6], 0 }
   0x2   :  { %15 = vsyncpa [#allocation4], 0 }
   0x3   :  { %16 = vsyncpa [#allocation9], 0  ;;  %s948_s24 = smov [#allocation2]  }
   0x4   :  { %s22_s25 = sshll.u32 %s948_s24, 4  ;;  %s23_s25 = int_to_ptr.vmem [resolvable:$true] %s22_s25 }
   0x5   :  { %s848_s26 = scalar_lea.vmem %s23_s25, 512  ;;  %p853_p1 = scmp.lt.s32.totalorder %s23_s25, %s23_s25 }
   0x6   :  { %p849_p0 = scmp.ne.s32.totalorder %s23_s25, %s848_s26  ;;  %p854_p2 = scmp.lt.s32.totalorder %s848_s26, %s848_s26 }
   0x8   :  { %p855_p3 = por %p854_p2, %p853_p1 }
   0xa   :  { %p856_p4 = pnand %p855_p3, %p849_p0 }
   0xc   :  { %859 = shalt.err (!%p856_p4)
}
   0xd   :  { %s949_s27 = smov 256   ;;  %s950_s28 = smov 16  }
   0xe   :  { %28 = dma.hbm_to_vmem [thread:$0]  %s1066_s0, 512, %s23_s25, [#allocation3], %s949_s27, %s949_s27, %s950_s28  }
   0xf   :  { %s951_s8 = smov [#allocation5]  }
  0x10   :  { %s39_s9 = sshll.u32 %s951_s8, 4  ;;  %s40_s9 = int_to_ptr.vmem [resolvable:$true] %s39_s9 }
  0x11   :  { %s868_s10 = scalar_lea.vmem %s40_s9, 512  ;;  %p873_p6 = scmp.lt.s32.totalorder %s40_s9, %s40_s9 }
  0x12   :  { %p869_p5 = scmp.ne.s32.totalorder %s40_s9, %s868_s10  ;;  %p874_p7 = scmp.lt.s32.totalorder %s868_s10, %s868_s10 }
  0x14   :  { %p875_p8 = por %p874_p7, %p873_p6 }
  0x16   :  { %p876_p9 = pnand %p875_p8, %p869_p5 }
  0x18   :  { %879 = shalt.err (!%p876_p9)
}
  0x19   :  { %42 = dma.hbm_to_vmem [thread:$0]  %s1069_s3, 512, %s40_s9, [#allocation6]  }
  0x1a   :  { %940 = dma.done.wait [#allocation3], 512  }
  0x1b   :  { %941 = vsyncadd [#allocation3], 4294966784 }
  0x1c   :  { %942 = dma.done.wait [#allocation6], 512  }
  0x1d   :  { %943 = vsyncadd [#allocation6], 4294966784  ;;  %vm67_vm0 = vcmask 1043456   ;;  %v51_v0 = vld [vmem:[#allocation2] sm:$0xff]  ;;  %v52_v1 = vld [vmem:[#allocation2 + $0x8] sm:$0xff]  ;;  %v952_v23 = vmov 0.0   ;;  %v92_v24 = vlaneseq }
  0x1e   :  { %v53_v2 = vld [vmem:[#allocation2 + $0x10] sm:$0xff]  ;;  %v59_v3 = vcombine.high %v51_v0, %v51_v0  ;;  %v60_v4 = vcombine.high %v52_v1, %v52_v1  ;;  %v68_v5 = vsel %vm67_vm0, %v51_v0, 0.0  ;;  %v54_v6 = vld [vmem:[#allocation2 + $0x18] sm:$0xff]  ;;  %v71_v10 = vsel %vm67_vm0, %v52_v1, 0.0  ;;  %v89_v22 = vld [vmem:[%s1067_s1] sm:$0xf]  ;;  %803 = vmatprep.subr.mxu0 %v952_v23  ;;  %808 = vmatprep.subr.mxu1 %v952_v23 }
  0x1f   :  { %v61_v7 = vcombine.high %v53_v2, %v53_v2  ;;  %v77_v8 = vsel %vm67_vm0, %v53_v2, 0.0  ;;  %v62_v11 = vcombine.high %v54_v6, %v54_v6  ;;  %v80_v14 = vsel %vm67_vm0, %v54_v6, 0.0  ;;  %804 = vmatpush3.msk.msra.mxu0 %vm67_vm0, %v89_v22  ;;  %v181_v35 = vld [vmem:[%s1068_s2] sm:$0x3]  ;;  %v275_v49 = vld [vmem:[#allocation5 + $0x8] sm:$0xff]  ;;  %v276_v52 = vld [vmem:[#allocation5 + $0x10] sm:$0xff] }
  0x20   :  { %v69_v9 = vsel %vm67_vm0, %v59_v3, 0.0  ;;  %v73_v15 = vsel %vm67_vm0, %v60_v4, 0.0  ;;  %vm953_vm1 = vmmov 0   ;;  %v93_v25 = vand.u32 127, %v92_v24  ;;  %v274_v48 = vld [vmem:[#allocation5] sm:$0xff]  ;;  %v277_v53 = vld [vmem:[#allocation5 + $0x18] sm:$0xff] }
  0x21   :  { %v70_v12 = vadd.f32 %v69_v9, %v68_v5  ;;  %v78_v13 = vsel %vm67_vm0, %v61_v7, 0.0  ;;  %v82_v19 = vsel %vm67_vm0, %v62_v11, 0.0  ;;  %805 = vmatprep.mubr.msk.f32.mxu0 %vm953_vm1, %v952_v23  ;;  %810 = vmatprep.mubr.msk.f32.mxu1 %vm953_vm1, %v952_v23  ;;  %v1022_v26 = vshrl.u32 %v92_v24, 7  ;;  %v656_v59 = vld [vmem:[%s1070_s4] sm:$0xf]  ;;  %s954_s15 = smov [#allocation7]  }
  0x22   :  { %v79_v16 = vadd.f32 %v78_v13, %v77_v8  ;;  %vm102_vm2 = vcmask 1041409   ;;  %vm104_vm3 = vcmask 31744   ;;  %vm186_vm4 = vcmask 1041408   ;;  %s738_s16 = sshll.u32 %s954_s15, 4  ;;  %s739_s16 = int_to_ptr.vmem [resolvable:$true] %s738_s16 }
  0x23   :  { %v72_v17 = vadd.f32 %v71_v10, %v70_v12  ;;  %v96_v28 = vsub.s32 %v93_v25, %v1022_v26  ;;  %809 = vmatpush3.msk.msra.mxu1 %vm186_vm4, %v181_v35  ;;  %vm182_vm5 = vcmask 15360   ;;  %vm261_vm6 = vcmask 25600   ;;  %s880_s17 = scalar_lea.vmem %s739_s16, 32  ;;  %p885_p11 = scmp.lt.s32.totalorder %s739_s16, %s739_s16 }
  0x24   :  { %v81_v18 = vadd.f32 %v80_v14, %v79_v16  ;;  %v282_v50 = vcombine.high %v274_v48, %v274_v48  ;;  %v283_v51 = vcombine.high %v275_v49, %v275_v49  ;;  %v284_v54 = vcombine.high %v276_v52, %v276_v52  ;;  %p881_p10 = scmp.ne.s32.totalorder %s739_s16, %s880_s17  ;;  %p886_p12 = scmp.lt.s32.totalorder %s880_s17, %s880_s17 }
  0x25   :  { %v74_v20 = vadd.f32 %v73_v15, %v72_v17  ;;  %v285_v55 = vcombine.high %v277_v53, %v277_v53 }
  0x26   :  { %v83_v21 = vadd.f32 %v82_v19, %v81_v18  ;;  %779 = vmatprep.subr.msk.mxu0 %vm67_vm0, %v282_v50  ;;  %782 = vmatprep.subr.msk.mxu1 %vm67_vm0, %v283_v51  ;;  %p887_p13 = por %p886_p12, %p885_p11 }
  0x27   :  { %75 = vadd.xlane.f32.xlu0 %v74_v20 }
  0x28   :  { %p888_p0 = pnand %p887_p13, %p881_p10 }
  0x2b   :  { %84 = vadd.xlane.f32.xlu0 %v83_v21 }
  0xb0   :  { %v76_v27 = vpop.xlane.xlu0 %75 }
  0xb1   :  { %v87_v29 = vmul.f32 0.001953125, %v76_v27 }
  0xb3   :  { %v97_v32 = vrot.slane %v87_v29, %v96_v28 }
  0xb4   :  { %v85_v30 = vpop.xlane.xlu0 %84 }
  0xb5   :  { %v88_v31 = vmul.f32 0.001953125, %v85_v30 }
  0xb7   :  { %v101_v33 = vrot.slane %v88_v31, %v96_v28 }
  0xb9   :  { %v103_v34 = vsel %vm102_vm2, %v101_v33, %v97_v32 }
  0xba   :  { %806 = vmatmul.mubr.msk.f32.vlgmr.msra.gmra.mxu0 %vm104_vm3, %v103_v34 }
  0xbb   :  { %369 = vmatprep.mubr.f32.mxu0 %v952_v23  ;;  %780 = vmatpush1.msk.msra.mxu0 %vm67_vm0, %v274_v48 }
  0xbc   :  { %785 = vmatprep.subr.msk.mxu0 %vm67_vm0, %v284_v54 }
 0x17a   :  { %v176_v36 = vpop.f32.mrf.mxu0 }
 0x17b   :  { %v180_v37 = vmax.f32 %v176_v36, 0.0 }
 0x17c   :  { %v807_v38 = vpop.f32.mrf.mxu0 }
 0x17d   :  { %811 = vmatmul.mubr.msk.f32.vlgmr.msra.gmra.mxu1 %vm182_vm5, %v180_v37 }
 0x17e   :  { %440 = vmatprep.mubr.f32.mxu1 %v952_v23  ;;  %783 = vmatpush1.msk.msra.mxu1 %vm67_vm0, %v275_v49 }
 0x17f   :  { %788 = vmatprep.subr.msk.mxu1 %vm67_vm0, %v285_v55 }
 0x23d   :  { %v256_v39 = vpop.f32.mrf.mxu1 }
 0x23e   :  { %v260_v40 = vmul.f32 0.029411765, %v256_v39 }
 0x23f   :  { %v812_v41 = vpop.f32.mrf.mxu1 }
 0x240   :  { %v262_v42 = vsel %vm261_vm6, %v260_v40, -inf }
 0x241   :  { %263 = vmax.xlane.f32.xlu1 %v262_v42 }
 0x2ca   :  { %v264_v43 = vpop.xlane.xlu1 %263 }
 0x2cb   :  { %v265_v44 = vsub.f32 %v260_v40, %v264_v43 }
 0x2cd   :  { %v266_v45 = vmul.f32 1.442695, %v265_v44 }
 0x2cf   :  { %836 = vpow2.f32 %v266_v45 }
 0x2dc   :  { %v837_v46 = vpop.eup %836 }
 0x2dd   :  { %v268_v47 = vsel %vm261_vm6, %v837_v46, 0.0 }
 0x2de   :  { %269 = vadd.xlane.f32.xlu1 %v268_v47 }
 0x367   :  { %v270_v56 = vpop.xlane.xlu1 %269 }
 0x368   :  { %838 = vrcp.f32 %v270_v56 }
 0x375   :  { %v839_v57 = vpop.eup %838 }
 0x376   :  { %v272_v58 = vmul.f32 %v839_v57, %v837_v46 }
 0x378   :  { %273 = vst.msk [vmem:[#allocation7] sm:$0x3] %vm261_vm6, %v272_v58  ;;  %781 = vmatmul.mubr.msk.f32.vlgmr.msra.gmra.mxu0 %vm104_vm3, %v272_v58  ;;  %784 = vmatmul.mubr.msk.f32.vlgmr.msra.gmra.mxu1 %vm104_vm3, %v272_v58 }
 0x379   :  { %786 = vmatpush1.msk.msra.mxu0 %vm67_vm0, %v276_v52  ;;  %789 = vmatpush1.msk.msra.mxu1 %vm67_vm0, %v277_v53 }
 0x37a   :  { %511 = vmatprep.mubr.f32.mxu0 %v952_v23  ;;  %582 = vmatprep.mubr.f32.mxu1 %v952_v23 }
 0x37b   :  { %813 = vmatprep.subr.mxu0 %v952_v23 }
 0x37c   :  { %787 = vmatmul.mubr.msk.f32.vlgmr.msra.gmra.mxu0 %vm104_vm3, %v272_v58  ;;  %790 = vmatmul.mubr.msk.f32.vlgmr.msra.gmra.mxu1 %vm104_vm3, %v272_v58 }
 0x37d   :  { %814 = vmatpush3.msk.msra.mxu0 %vm67_vm0, %v656_v59  ;;  %815 = vmatprep.mubr.msk.f32.mxu0 %vm953_vm1, %v952_v23 }
 0x380   :  { %816 = vmatmul.mubr.msk.f32.vlgmr.msra.gmra.mxu0 %vm104_vm3, %v272_v58 }
 0x381   :  { %891 = shalt.err (!%p888_p0)
}
 0x382   :  { %741 = dma.vmem_to_hbm [thread:$0]  %s739_s16, 32, %s1071_s5, [#allocation4]   ;;  %v955_v60 = vmov 1966171168   ;;  %vm730_vm7 = vcmask 58368  }
 0x383   :  { %v610_v61 = vunpack.c.l.s4 %v955_v60  ;;  %s956_s5 = smov [#allocation8]   ;;  %s957_s20 = smov [#allocation10]  }
 0x384   :  { %s748_s19 = sshll.u32 %s956_s5, 4  ;;  %s758_s21 = sshll.u32 %s957_s20, 4  ;;  %s749_s19 = int_to_ptr.vmem [resolvable:$true] %s748_s19  ;;  %s759_s21 = int_to_ptr.vmem [resolvable:$true] %s758_s21 }
 0x385   :  { %v611_v62 = vunpack.c.0.s8 %v610_v61  ;;  %s900_s22 = scalar_lea.vmem %s749_s19, 128  ;;  %p905_p2 = scmp.lt.s32.totalorder %s749_s19, %s749_s19 }
 0x386   :  { %p901_p1 = scmp.ne.s32.totalorder %s749_s19, %s900_s22  ;;  %p906_p3 = scmp.lt.s32.totalorder %s900_s22, %s900_s22 }
 0x387   :  { %v614_v1 = vsub.s32 %v611_v62, %v1022_v26 }
 0x388   :  { %p907_p4 = por %p906_p3, %p905_p2 }
 0x38a   :  { %p908_p5 = pnand %p907_p4, %p901_p1 }
 0x438   :  { %v371_v63 = vpop.f32.mrf.mxu0  ;;  %v442_v0 = vpop.f32.mrf.mxu1 }
 0x43a   :  { %v373_v2 = vpop.f32.mrf.mxu0  ;;  %v444_v3 = vpop.f32.mrf.mxu1 }
 0x43b   :  { %v791_v4 = vpack.c.bf16 %v373_v2, %v371_v63  ;;  %v792_v5 = vpack.c.bf16 %v444_v3, %v442_v0 }
 0x43c   :  { %v513_v6 = vpop.f32.mrf.mxu0  ;;  %v584_v7 = vpop.f32.mrf.mxu1 }
 0x43d   :  { %v615_v8 = vrot.slane %v791_v4, %v614_v1  ;;  %v622_v9 = vrot.slane %v792_v5, %v614_v1 }
 0x43e   :  { %v515_v10 = vpop.f32.mrf.mxu0  ;;  %v586_v11 = vpop.f32.mrf.mxu1 }
 0x43f   :  { %v793_v12 = vpack.c.bf16 %v515_v10, %v513_v6  ;;  %v794_v13 = vpack.c.bf16 %v586_v11, %v584_v7  ;;  %v637_v15 = vcombine.low %v615_v8, %v622_v9 }
 0x440   :  { %v726_v14 = vpop.f32.mrf.mxu0 }
 0x441   :  { %v629_v16 = vrot.slane %v793_v12, %v614_v1  ;;  %v636_v17 = vrot.slane %v794_v13, %v614_v1  ;;  %731 = vst.msk [vmem:[#allocation10] sm:$0x3] %vm730_vm7, %v726_v14  ;;  %v645_v20 = vrot.slane %v637_v15, %v614_v1 }
 0x442   :  { %v817_v18 = vpop.f32.mrf.mxu0 }
 0x443   :  { %v638_v19 = vcombine.low %v629_v16, %v636_v17 }
 0x445   :  { %v652_v21 = vrot.slane %v638_v19, %v614_v1 }
 0x447   :  { %v653_v22 = vcombine.low %v645_v20, %v652_v21 }
 0x449   :  { %655 = vst [vmem:[#allocation8] sm:$0xff] %v653_v22 }
 0x44a   :  { %911 = shalt.err (!%p908_p5)
}
 0x44b   :  { %751 = dma.vmem_to_hbm [thread:$0]  %s749_s19, 128, %s1072_s6, [#allocation9]  }
 0x44c   :  { %s920_s25 = scalar_lea.vmem %s759_s21, 32  ;;  %p925_p7 = scmp.lt.s32.totalorder %s759_s21, %s759_s21 }
 0x44d   :  { %p921_p6 = scmp.ne.s32.totalorder %s759_s21, %s920_s25  ;;  %p926_p8 = scmp.lt.s32.totalorder %s920_s25, %s920_s25 }
 0x44f   :  { %p927_p9 = por %p926_p8, %p925_p7 }
 0x451   :  { %p928_p10 = pnand %p927_p9, %p921_p6 }
 0x453   :  { %931 = shalt.err (!%p928_p10)
}
 0x454   :  { %761 = dma.vmem_to_hbm [thread:$0]  %s759_s21, 32, %s1073_s7, [#allocation9]  }
 0x455   :  { %944 = dma.done.wait [#allocation4], 32  }
 0x456   :  { %945 = vsyncadd [#allocation4], 4294967264 }
 0x457   :  { %946 = dma.done.wait [#allocation9], 160  }
 0x458   :  { %947 = vsyncadd [#allocation9], 4294967136 }
 0x459   :  { %771 = vsyncpa [#allocation3], 1 }
 0x45a   :  { %772 = vsyncpa [#allocation6], 1 }
 0x45b   :  { %773 = vsyncpa [#allocation4], 1 }
 0x45c   :  { %774 = vsyncpa [#allocation9], 1 }

</bundles_post_ra>
